<compile_context>
chip_gen: v5e
topology: v5e:2x2
jax: 0.10.0
libtpu: 0.0.40
codegen_flags: <defaults>
</compile_context>

<pallas_src>
import functools
import math

import jax
import jax.numpy as jnp
from jax.experimental import pallas as pl
from jax.experimental.pallas import tpu as pltpu


_VMEM_LIMIT = 48 * 1024 * 1024  # safe on v5e/v6e (128 MiB) and v7x (64 MiB physical)


# ----------------------------------------------------------------------------
# Kernel 1: dilated 3x3 conv (im2col, single MXU contraction) + partial stats.
# ----------------------------------------------------------------------------
def _conv_stats_kernel(xb_ref, xh_ref, w_ref, y_ref, stats_ref, *, h_real, mask_stats):
    # xb_ref   : (1, TH,  W+2d, Cin)  bf16   rows [t*TH, t*TH+TH) of padded x
    # xh_ref   : (1, 2d,  W+2d, Cin)  bf16   rows [t*TH+TH, t*TH+TH+2d)  (halo)
    # w_ref    : (9*Cin, Cout)        bf16   flattened (kw, kh, cin)-major
    # y_ref    : (1, TH, W, Cout)     f32    pre-BN conv output
    # stats_ref: (1, 1, 8, Cout)      f32    row0 = sum, row1 = sum of squares
    th, w_out, cout = y_ref.shape[1], y_ref.shape[2], y_ref.shape[3]
    d = xh_ref.shape[1] // 2

    # Assemble the (TH+2d)-row band (row axis is untiled in-vreg -> cheap concat).
    band = jnp.concatenate([xb_ref[0], xh_ref[0]], axis=0)          # (TH+2d, Wp, Cin)

    # im2col: the 3 kh shifts are along the untiled row axis (free slices); the 3 kw
    # shifts are done once on the merged slab (3 sublane-offset slices instead of 9).
    slab = jnp.concatenate(
        [band[kh * d: kh * d + th] for kh in range(3)], axis=-1)    # (TH, Wp, 3*Cin)
    lhs = jnp.concatenate(
        [slab[:, kw * d: kw * d + w_out, :] for kw in range(3)], axis=-1)  # (TH, W, 9*Cin)

    # Single bf16 MXU contraction, f32 accumulation.
    acc = jnp.dot(lhs.reshape(th * w_out, lhs.shape[-1]), w_ref[...],
                  preferred_element_type=jnp.float32)               # (TH*W, Cout)
    y_ref[0] = acc.reshape(th, w_out, cout).astype(y_ref.dtype)

    # Per-tile partial BN statistics (reduced over the grid in plain JAX).
    if mask_stats:
        # The last tile may contain zero-padded tail rows whose conv output is nonzero
        # near the boundary; mask those rows out of the statistics.
        t = pl.program_id(1)
        valid = jnp.minimum(th, h_real - t * th)
        rows = jax.lax.broadcasted_iota(jnp.int32, (th * w_out, 1), 0) // w_out
        m = (rows < valid).astype(jnp.float32)
        acc_m = acc * m
        s = jnp.sum(acc_m, axis=0, keepdims=True)
        q = jnp.sum(acc_m * acc, axis=0, keepdims=True)
    else:
        s = jnp.sum(acc, axis=0, keepdims=True)
        q = jnp.sum(acc * acc, axis=0, keepdims=True)
    st = jnp.concatenate([s, q, jnp.zeros((6, cout), jnp.float32)], axis=0)  # (8, Cout)
    stats_ref[...] = st.reshape(1, 1, 8, cout)


# ----------------------------------------------------------------------------
# Kernel 2a: BN apply + LeakyReLU(0.2), with the NHWC->NCHW transpose fused
#            into a lane-dense (Cout, TH*W) store.
# ----------------------------------------------------------------------------
def _bn_lrelu_nchw_kernel(y_ref, scale_ref, shift_ref, o_ref):
    th, w, c = y_ref.shape[1], y_ref.shape[2], y_ref.shape[3]
    z = y_ref[0].reshape(th * w, c)                                 # (TH*W, Cout)
    z = z * scale_ref[...] + shift_ref[...]                         # broadcast (1, Cout)
    z = jnp.where(z >= 0, z, jnp.float32(0.2) * z)
    o_ref[0] = z.T                                                  # (Cout, TH*W), XLU


# Kernel 2b: fallback (keeps NHWC; transpose done by XLA outside).
def _bn_lrelu_nhwc_kernel(y_ref, scale_ref, shift_ref, o_ref):
    c = y_ref.shape[3]
    z = (y_ref[...] * scale_ref[...].reshape(1, 1, 1, c)
         + shift_ref[...].reshape(1, 1, 1, c))
    o_ref[...] = jnp.where(z >= 0, z, jnp.float32(0.2) * z)


# ----------------------------------------------------------------------------
# Tile-row chooser: largest multiple of lcm(8, 2d) whose per-step footprint
# (double-buffered blocks + in-kernel temps) stays under a conservative budget.
# ----------------------------------------------------------------------------
def _pick_tile_rows(H, W, Cin, Cout, d, budget_bytes=16 << 20):
    two_d = 2 * d
    align = 8 * two_d // math.gcd(8, two_d)          # lcm(8, 2d)
    wp = W + two_d
    per_row = (2 * wp * Cin * 2                      # bulk band, bf16, double-buffered
               + 2 * W * Cout * 4                    # y tile, f32, double-buffered
               + 4 * wp * Cin * 2                    # band + kh-slab temps (bf16)
               + 9 * W * Cin * 2                     # im2col LHS (bf16)
               + W * Cout * 4)                       # f32 accumulator
    th = max(align, (budget_bytes // max(per_row, 1)) // align * align)
    cap = ((H + align - 1) // align) * align
    return min(th, cap)


# ----------------------------------------------------------------------------
# Wrapper: NCHW in / NCHW out, matching the PyTorch module.
# ----------------------------------------------------------------------------
def conv_relu(x_nchw, weight, bias, gamma, beta, *, dirate=1, eps=1e-5,
              tile_rows=None, compute_dtype=jnp.bfloat16):
    """x_nchw: (N, Cin, H, W); weight: (Cout, Cin, 3, 3); bias/gamma/beta: (Cout,)."""
    del bias  # Training-mode BatchNorm exactly cancels a per-channel conv bias.

    N, Cin, H, W = x_nchw.shape
    Cout = weight.shape[0]
    d = int(dirate)
    two_d = 2 * d
    align = 8 * two_d // math.gcd(8, two_d)          # lcm(8, 2d)

    if tile_rows is None:
        tile_rows = _pick_tile_rows(H, W, Cin, Cout, d)
    if tile_rows % align != 0:
        raise ValueError(f"tile_rows must be a multiple of {align}")
    TH = min(tile_rows, ((H + align - 1) // align) * align)
    NT = (H + TH - 1) // TH
    Hpad = NT * TH
    Wp = W + two_d
    halo_stride = TH // two_d                         # halo block index multiplier

    # Glue: NCHW->NHWC + bf16 cast + zero pad (XLA fuses these into one pass).
    x = jnp.transpose(x_nchw, (0, 2, 3, 1)).astype(compute_dtype)
    x_pad = jnp.pad(x, ((0, 0), (d, d + Hpad - H), (d, d), (0, 0)))  # (N, Hpad+2d, Wp, Cin)
    # Weights flattened (kw, kh, cin)-major to match the im2col channel order.
    w_flat = jnp.transpose(weight, (3, 2, 1, 0)).reshape(9 * Cin, Cout).astype(compute_dtype)

    itemsize_x = jnp.dtype(compute_dtype).itemsize
    cost = pl.CostEstimate(
        flops=2 * N * Hpad * W * 9 * Cin * Cout,
        transcendentals=0,
        bytes_accessed=int(x_pad.size * itemsize_x
                           + N * NT * two_d * Wp * Cin * itemsize_x   # halo re-reads
                           + w_flat.size * itemsize_x
                           + N * Hpad * W * Cout * 4
                           + N * NT * 8 * Cout * 4))

    conv_call = pl.pallas_call(
        functools.partial(_conv_stats_kernel, h_real=H, mask_stats=(Hpad != H)),
        out_shape=(
            jax.ShapeDtypeStruct((N, Hpad, W, Cout), jnp.float32),   # pre-BN conv
            jax.ShapeDtypeStruct((N, NT, 8, Cout), jnp.float32),     # per-tile stats
        ),
        grid=(N, NT),
        in_specs=[
            # TH-row bulk band (non-overlapping, auto-pipelined).
            pl.BlockSpec((1, TH, Wp, Cin), lambda n, t: (n, t, 0, 0)),
            # 2d-row halo: a second view of the same padded input.
            pl.BlockSpec((1, two_d, Wp, Cin),
                         lambda n, t: (n, (t + 1) * halo_stride, 0, 0)),
            pl.BlockSpec((9 * Cin, Cout), lambda n, t: (0, 0)),
        ],
        out_specs=(
            pl.BlockSpec((1, TH, W, Cout), lambda n, t: (n, t, 0, 0)),
            pl.BlockSpec((1, 1, 8, Cout), lambda n, t: (n, t, 0, 0)),
        ),
        compiler_params=pltpu.CompilerParams(
            dimension_semantics=("parallel", "parallel"),
            vmem_limit_bytes=_VMEM_LIMIT),
        cost_estimate=cost,
    )
    y, stats = conv_call(x_pad, x_pad, w_flat)

    # BN batch statistics (training-mode forward), folded to scale/shift.
    # TODO(synk): use a compensated / Welford accumulation for very large N*H*W.
    ch_sum = jnp.sum(stats[:, :, 0, :], axis=(0, 1))                 # (Cout,)
    ch_ssq = jnp.sum(stats[:, :, 1, :], axis=(0, 1))
    count = jnp.float32(N * H * W)
    mean = ch_sum / count
    var = jnp.maximum(ch_ssq / count - mean * mean, 0.0)             # biased variance
    inv_std = jax.lax.rsqrt(var + jnp.float32(eps))
    g32 = gamma.astype(jnp.float32)
    scale = (g32 * inv_std).reshape(1, Cout)
    shift = (beta.astype(jnp.float32) - mean * g32 * inv_std).reshape(1, Cout)

    common_bn_kwargs = dict(
        grid=(N, NT),
        in_specs=[
            pl.BlockSpec((1, TH, W, Cout), lambda n, t: (n, t, 0, 0)),
            pl.BlockSpec((1, Cout), lambda n, t: (0, 0)),
            pl.BlockSpec((1, Cout), lambda n, t: (0, 0)),
        ],
        compiler_params=pltpu.CompilerParams(
            dimension_semantics=("parallel", "parallel"),
            vmem_limit_bytes=_VMEM_LIMIT),
    )

    if (TH * W) % 128 == 0:
        # Fused NHWC->NCHW transpose with a lane-dense (Cout, TH*W) store; padded tail
        # rows (if any) land in rows >= H and are dropped by the final reshape/slice.
        out_flat = pl.pallas_call(
            _bn_lrelu_nchw_kernel,
            out_shape=jax.ShapeDtypeStruct((N, Cout, Hpad * W), jnp.float32),
            out_specs=pl.BlockSpec((1, Cout, TH * W), lambda n, t: (n, 0, t)),
            **common_bn_kwargs,
        )(y, scale, shift)
        out = out_flat.reshape(N, Cout, Hpad, W)      # free (metadata) reshape
        if Hpad != H:
            out = out[:, :, :H, :]
        return out

    # TODO(synk): fold the transpose into the store for shapes where TH*W is not
    # 128-aligned as well (e.g. deep U^2-Net stages with small W).
    out_nhwc = pl.pallas_call(
        _bn_lrelu_nhwc_kernel,
        out_shape=jax.ShapeDtypeStruct((N, Hpad, W, Cout), jnp.float32),
        out_specs=pl.BlockSpec((1, TH, W, Cout), lambda n, t: (n, t, 0, 0)),
        **common_bn_kwargs,
    )(y, scale, shift)
    out = jnp.transpose(out_nhwc, (0, 3, 1, 2))
    if Hpad != H:
        out = out[:, :, :H, :]
    return out


if __name__ == "__main__":
    # Small shapes consistent with the module (ConvReLU(in, out, dirate)).
    N, Cin, H, W = 2, 4, 16, 16
    Cout = 8
    dirate = 2

    key = jax.random.PRNGKey(0)
    kx, kw_, kb, kg, kbeta = jax.random.split(key, 5)
    x = jax.random.normal(kx, (N, Cin, H, W), dtype=jnp.float32)
    weight = jax.random.normal(kw_, (Cout, Cin, 3, 3), dtype=jnp.float32) * 0.1
    bias = jax.random.normal(kb, (Cout,), dtype=jnp.float32) * 0.1
    gamma = 1.0 + 0.1 * jax.random.normal(kg, (Cout,), dtype=jnp.float32)
    beta = 0.1 * jax.random.normal(kbeta, (Cout,), dtype=jnp.float32)

    # tile_rows=8 -> two row tiles per image: exercises the halo/tiling path.
    fn = jax.jit(functools.partial(conv_relu, dirate=dirate, tile_rows=8))
    out = fn(x, weight, bias, gamma, beta)
    jax.block_until_ready(out)
    assert out.shape == (N, Cout, H, W)

    # Pure-JAX reference (same bf16 rounding of the matmul inputs).
    xb = x.astype(jnp.bfloat16).astype(jnp.float32)
    wb = weight.astype(jnp.bfloat16).astype(jnp.float32)
    conv = jax.lax.conv_general_dilated(
        xb, wb, window_strides=(1, 1), padding=[(dirate, dirate)] * 2,
        rhs_dilation=(dirate, dirate),
        dimension_numbers=("NCHW", "OIHW", "NCHW"),
        precision=jax.lax.Precision.HIGHEST) + bias[None, :, None, None]
    mean = conv.mean(axis=(0, 2, 3), keepdims=True)
    var = conv.var(axis=(0, 2, 3), keepdims=True)          # biased (training-mode BN)
    bn = (gamma[None, :, None, None] * (conv - mean) * jax.lax.rsqrt(var + 1e-5)
          + beta[None, :, None, None])
    ref = jnp.where(bn >= 0, bn, 0.2 * bn)
    err = float(jnp.max(jnp.abs(out - ref)))
    assert err < 5e-2, f"max |err| = {err}"

    print("KERNEL_OK")
</pallas_src>

<mosaic_0001>
module attributes {stable_mosaic.version = 11 : i64} {
  func.func @_conv_stats_kernel(%arg0: i32, %arg1: i32, %arg2: memref<1x8x20x4xbf16, #tpu.memory_space<vmem>>, %arg3: memref<1x4x20x4xbf16, #tpu.memory_space<vmem>>, %arg4: memref<36x8xbf16, #tpu.memory_space<vmem>>, %arg5: memref<1x8x16x8xf32, #tpu.memory_space<vmem>>, %arg6: memref<1x1x8x8xf32, #tpu.memory_space<vmem>>) attributes {dimension_semantics = [#tpu.dimension_semantics<parallel>, #tpu.dimension_semantics<parallel>], iteration_bounds = array<i64: 2, 2>, scalar_prefetch = 0 : i64, scratch_operands = 0 : i64, tpu.core_type = #tpu.core_type<tc>, window_params = [{transform_indices = @transform_0, window_bounds = array<i64: 1, 8, 20, 4>}, {transform_indices = @transform_1, window_bounds = array<i64: 1, 4, 20, 4>}, {pipeline_mode = #tpu.pipeline_mode<synchronous>, transform_indices = @transform_2, window_bounds = array<i64: 36, 8>}, {transform_indices = @transform_3, window_bounds = array<i64: 1, 8, 16, 8>}, {transform_indices = @transform_4, window_bounds = array<i64: 1, 1, 8, 8>}]} {
    %c0 = arith.constant 0 : index
    %c0_0 = arith.constant 0 : index
    %c0_1 = arith.constant 0 : index
    %c0_2 = arith.constant 0 : index
    %0 = vector.load %arg2[%c0, %c0_0, %c0_1, %c0_2] : memref<1x8x20x4xbf16, #tpu.memory_space<vmem>>, vector<1x8x20x4xbf16>
    %1 = vector.shape_cast %0 : vector<1x8x20x4xbf16> to vector<8x20x4xbf16>
    %c0_3 = arith.constant 0 : index
    %c0_4 = arith.constant 0 : index
    %c0_5 = arith.constant 0 : index
    %c0_6 = arith.constant 0 : index
    %2 = vector.load %arg3[%c0_3, %c0_4, %c0_5, %c0_6] : memref<1x4x20x4xbf16, #tpu.memory_space<vmem>>, vector<1x4x20x4xbf16>
    %3 = vector.shape_cast %2 : vector<1x4x20x4xbf16> to vector<4x20x4xbf16>
    %4 = tpu.concatenate %1, %3 in 0 : vector<8x20x4xbf16>, vector<4x20x4xbf16> -> vector<12x20x4xbf16>
    %5 = vector.extract_strided_slice %4 {offsets = [0, 0, 0], sizes = [8, 20, 4], strides = [1, 1, 1]} : vector<12x20x4xbf16> to vector<8x20x4xbf16>
    %6 = vector.extract_strided_slice %4 {offsets = [2, 0, 0], sizes = [8, 20, 4], strides = [1, 1, 1]} : vector<12x20x4xbf16> to vector<8x20x4xbf16>
    %7 = vector.extract_strided_slice %4 {offsets = [4, 0, 0], sizes = [8, 20, 4], strides = [1, 1, 1]} : vector<12x20x4xbf16> to vector<8x20x4xbf16>
    %8 = tpu.concatenate %5, %6, %7 in 2 : vector<8x20x4xbf16>, vector<8x20x4xbf16>, vector<8x20x4xbf16> -> vector<8x20x12xbf16>
    %9 = vector.extract_strided_slice %8 {offsets = [0, 0, 0], sizes = [8, 16, 12], strides = [1, 1, 1]} : vector<8x20x12xbf16> to vector<8x16x12xbf16>
    %10 = vector.extract_strided_slice %8 {offsets = [0, 2, 0], sizes = [8, 16, 12], strides = [1, 1, 1]} : vector<8x20x12xbf16> to vector<8x16x12xbf16>
    %11 = vector.extract_strided_slice %8 {offsets = [0, 4, 0], sizes = [8, 16, 12], strides = [1, 1, 1]} : vector<8x20x12xbf16> to vector<8x16x12xbf16>
    %12 = tpu.concatenate %9, %10, %11 in 2 : vector<8x16x12xbf16>, vector<8x16x12xbf16>, vector<8x16x12xbf16> -> vector<8x16x36xbf16>
    %13 = vector.shape_cast %12 : vector<8x16x36xbf16> to vector<128x36xbf16>
    %c0_7 = arith.constant 0 : index
    %c0_8 = arith.constant 0 : index
    %14 = vector.load %arg4[%c0_7, %c0_8] : memref<36x8xbf16, #tpu.memory_space<vmem>>, vector<36x8xbf16>
    %cst = arith.constant dense<0.000000e+00> : vector<128x8xf32>
    %15 = tpu.matmul %13, %14, %cst {dimension_numbers = #tpu.dot_dimension_numbers<[1], [0], [0], [1], [0, 0, 1, 1], [], []>} : vector<128x36xbf16>, vector<36x8xbf16>, vector<128x8xf32> -> vector<128x8xf32>
    %16 = vector.shape_cast %15 : vector<128x8xf32> to vector<8x16x8xf32>
    %c0_9 = arith.constant 0 : index
    %c0_10 = arith.constant 0 : index
    %c0_11 = arith.constant 0 : index
    %c0_12 = arith.constant 0 : index
    %17 = vector.load %arg5[%c0_9, %c0_10, %c0_11, %c0_12] : memref<1x8x16x8xf32, #tpu.memory_space<vmem>>, vector<1x8x16x8xf32>
    %18 = vector.shape_cast %17 : vector<1x8x16x8xf32> to vector<8x16x8xf32>
    %19 = vector.shape_cast %16 : vector<8x16x8xf32> to vector<1x8x16x8xf32>
    tpu.vector_store %arg5[%c0_9, %c0_10, %c0_11, %c0_12], %19 {strides = array<i32>} : memref<1x8x16x8xf32, #tpu.memory_space<vmem>>, vector<1x8x16x8xf32>,
    %cst_13 = arith.constant dense<0.000000e+00> : vector<8xf32>
    %20 = vector.multi_reduction <add>, %15, %cst_13 [0] : vector<128x8xf32> to vector<8xf32>
    %21 = vector.shape_cast %20 : vector<8xf32> to vector<1x8xf32>
    %22 = arith.mulf %15, %15 : vector<128x8xf32>
    %cst_14 = arith.constant dense<0.000000e+00> : vector<8xf32>
    %23 = vector.multi_reduction <add>, %22, %cst_14 [0] : vector<128x8xf32> to vector<8xf32>
    %24 = vector.shape_cast %23 : vector<8xf32> to vector<1x8xf32>
    %cst_15 = arith.constant 0.000000e+00 : f32
    %25 = vector.broadcast %cst_15 : f32 to vector<6x8xf32>
    %26 = tpu.concatenate %21, %24, %25 in 0 : vector<1x8xf32>, vector<1x8xf32>, vector<6x8xf32> -> vector<8x8xf32>
    %27 = vector.shape_cast %26 : vector<8x8xf32> to vector<1x1x8x8xf32>
    %c0_16 = arith.constant 0 : index
    %c0_17 = arith.constant 0 : index
    %c0_18 = arith.constant 0 : index
    %c0_19 = arith.constant 0 : index
    %28 = vector.load %arg6[%c0_16, %c0_17, %c0_18, %c0_19] : memref<1x1x8x8xf32, #tpu.memory_space<vmem>>, vector<1x1x8x8xf32>
    tpu.vector_store %arg6[%c0_16, %c0_17, %c0_18, %c0_19], %27 {strides = array<i32>} : memref<1x1x8x8xf32, #tpu.memory_space<vmem>>, vector<1x1x8x8xf32>,
    return
  }
  func.func @transform_0(%arg0: i32, %arg1: i32) -> (i32, i32, i32, i32) {
    %c0_i32 = arith.constant 0 : i32
    %c0_i32_0 = arith.constant 0 : i32
    %c0_i32_1 = arith.constant 0 : i32
    return %arg0, %arg1, %c0_i32, %c0_i32_0 : i32, i32, i32, i32
  }
  func.func @transform_1(%arg0: i32, %arg1: i32) -> (i32, i32, i32, i32) {
    %c1_i32 = arith.constant 1 : i32
    %0 = arith.addi %arg1, %c1_i32 : i32
    %c2_i32 = arith.constant 2 : i32
    %1 = arith.muli %0, %c2_i32 : i32
    %c0_i32 = arith.constant 0 : i32
    %c0_i32_0 = arith.constant 0 : i32
    %c0_i32_1 = arith.constant 0 : i32
    return %arg0, %1, %c0_i32, %c0_i32_0 : i32, i32, i32, i32
  }
  func.func @transform_2(%arg0: i32, %arg1: i32) -> (i32, i32) {
    %c0_i32 = arith.constant 0 : i32
    %c0_i32_0 = arith.constant 0 : i32
    %c0_i32_1 = arith.constant 0 : i32
    return %c0_i32, %c0_i32_0 : i32, i32
  }
  func.func @transform_3(%arg0: i32, %arg1: i32) -> (i32, i32, i32, i32) {
    %c0_i32 = arith.constant 0 : i32
    %c0_i32_0 = arith.constant 0 : i32
    %c0_i32_1 = arith.constant 0 : i32
    return %arg0, %arg1, %c0_i32, %c0_i32_0 : i32, i32, i32, i32
  }
  func.func @transform_4(%arg0: i32, %arg1: i32) -> (i32, i32, i32, i32) {
    %c0_i32 = arith.constant 0 : i32
    %c0_i32_0 = arith.constant 0 : i32
    %c0_i32_1 = arith.constant 0 : i32
    return %arg0, %arg1, %c0_i32, %c0_i32_0 : i32, i32, i32, i32
  }
}

module attributes {stable_mosaic.version = 11 : i64} {
  func.func @_bn_lrelu_nchw_kernel(%arg0: i32, %arg1: i32, %arg2: memref<1x8x16x8xf32, #tpu.memory_space<vmem>>, %arg3: memref<1x8xf32, #tpu.memory_space<vmem>>, %arg4: memref<1x8xf32, #tpu.memory_space<vmem>>, %arg5: memref<1x8x128xf32, #tpu.memory_space<vmem>>) attributes {dimension_semantics = [#tpu.dimension_semantics<parallel>, #tpu.dimension_semantics<parallel>], iteration_bounds = array<i64: 2, 2>, scalar_prefetch = 0 : i64, scratch_operands = 0 : i64, tpu.core_type = #tpu.core_type<tc>, window_params = [{transform_indices = @transform_0, window_bounds = array<i64: 1, 8, 16, 8>}, {pipeline_mode = #tpu.pipeline_mode<synchronous>, transform_indices = @transform_1, window_bounds = array<i64: 1, 8>}, {pipeline_mode = #tpu.pipeline_mode<synchronous>, transform_indices = @transform_2, window_bounds = array<i64: 1, 8>}, {transform_indices = @transform_3, window_bounds = array<i64: 1, 8, 128>}]} {
    %c0 = arith.constant 0 : index
    %c0_0 = arith.constant 0 : index
    %c0_1 = arith.constant 0 : index
    %c0_2 = arith.constant 0 : index
    %0 = vector.load %arg2[%c0, %c0_0, %c0_1, %c0_2] : memref<1x8x16x8xf32, #tpu.memory_space<vmem>>, vector<1x8x16x8xf32>
    %1 = vector.shape_cast %0 : vector<1x8x16x8xf32> to vector<8x16x8xf32>
    %2 = vector.shape_cast %1 : vector<8x16x8xf32> to vector<128x8xf32>
    %c0_3 = arith.constant 0 : index
    %c0_4 = arith.constant 0 : index
    %3 = vector.load %arg3[%c0_3, %c0_4] : memref<1x8xf32, #tpu.memory_space<vmem>>, vector<1x8xf32>
    %4 = vector.broadcast %3 : vector<1x8xf32> to vector<128x8xf32>
    %5 = arith.mulf %2, %4 : vector<128x8xf32>
    %c0_5 = arith.constant 0 : index
    %c0_6 = arith.constant 0 : index
    %6 = vector.load %arg4[%c0_5, %c0_6] : memref<1x8xf32, #tpu.memory_space<vmem>>, vector<1x8xf32>
    %7 = vector.broadcast %6 : vector<1x8xf32> to vector<128x8xf32>
    %8 = arith.addf %5, %7 : vector<128x8xf32>
    %cst = arith.constant 0.000000e+00 : f32
    %9 = vector.broadcast %cst : f32 to vector<128x8xf32>
    %10 = arith.cmpf oge, %8, %9 : vector<128x8xf32>
    %cst_7 = arith.constant 2.000000e-01 : f32
    %11 = vector.broadcast %cst_7 : f32 to vector<128x8xf32>
    %12 = arith.mulf %11, %8 : vector<128x8xf32>
    %13 = arith.select %10, %8, %12 : vector<128x8xi1>, vector<128x8xf32>
    %14 = tpu.transpose %13, [1, 0] : vector<128x8xf32> -> vector<8x128xf32>
    %c0_8 = arith.constant 0 : index
    %c0_9 = arith.constant 0 : index
    %c0_10 = arith.constant 0 : index
    %15 = vector.load %arg5[%c0_8, %c0_9, %c0_10] : memref<1x8x128xf32, #tpu.memory_space<vmem>>, vector<1x8x128xf32>
    %16 = vector.shape_cast %15 : vector<1x8x128xf32> to vector<8x128xf32>
    %17 = vector.shape_cast %14 : vector<8x128xf32> to vector<1x8x128xf32>
    tpu.vector_store %arg5[%c0_8, %c0_9, %c0_10], %17 {strides = array<i32>} : memref<1x8x128xf32, #tpu.memory_space<vmem>>, vector<1x8x128xf32>,
    return
  }
  func.func @transform_0(%arg0: i32, %arg1: i32) -> (i32, i32, i32, i32) {
    %c0_i32 = arith.constant 0 : i32
    %c0_i32_0 = arith.constant 0 : i32
    %c0_i32_1 = arith.constant 0 : i32
    return %arg0, %arg1, %c0_i32, %c0_i32_0 : i32, i32, i32, i32
  }
  func.func @transform_1(%arg0: i32, %arg1: i32) -> (i32, i32) {
    %c0_i32 = arith.constant 0 : i32
    %c0_i32_0 = arith.constant 0 : i32
    %c0_i32_1 = arith.constant 0 : i32
    return %c0_i32, %c0_i32_0 : i32, i32
  }
  func.func @transform_2(%arg0: i32, %arg1: i32) -> (i32, i32) {
    %c0_i32 = arith.constant 0 : i32
    %c0_i32_0 = arith.constant 0 : i32
    %c0_i32_1 = arith.constant 0 : i32
    return %c0_i32, %c0_i32_0 : i32, i32
  }
  func.func @transform_3(%arg0: i32, %arg1: i32) -> (i32, i32, i32) {
    %c0_i32 = arith.constant 0 : i32
    %c0_i32_0 = arith.constant 0 : i32
    return %arg0, %c0_i32, %arg1 : i32, i32, i32
  }
}

</mosaic_0001>

<bundles_post_ra>
// kernel: conv_relu.3
= control target key start
LH: loop header
LB: loop body
LE: loop exit
PB: predicated region body
PF: predicated region fallthrough
CT: control target
= control target key end

     0   :  { %s551_s12 = smov 0   ;;  %s553_s13 = smov 0   ;;  %s671_s0 = inlined_call_operand.vmem [shape: f32[2,16,16,8], index: 0, kind: input, shape index: {}]   ;;  %s672_s1 = inlined_call_operand.vmem [shape: f32[1,8], index: 1, kind: input, shape index: {}]   ;;  %s673_s2 = inlined_call_operand.vmem [shape: f32[1,8], index: 2, kind: input, shape index: {}]   ;;  %s674_s3 = inlined_call_operand.vmem [shape: f32[2,8,256], index: 3, kind: output, shape index: {}]  }
   0x1   :  { %s555_s14 = smov 0   ;;  %s557_s15 = smov 0  }
   0x2   :  { %s559_s16 = smov 0  }
   0x3 LB: > { %s22_s17 = sadd.s32 1, %s521_s14  ;;  %s25_s18 = sadd.s32 1, %s525_s15  ;;  %s529_s16 = sphi %s559_s16, %s13_s16   ;;  %s525_s15 = sphi %s557_s15, %s678_s15   ;;  %s521_s14 = sphi %s555_s14, %s677_s14   ;;  %s517_s13 = sphi %s553_s13, %s676_s13   ;;  %s513_s12 = sphi %s551_s12, %s675_s12  }
   0x4   : > { %p23_p0 = scmp.ge.s32.totalorder %s22_s17, 2  ;;  %p440_p1 = scmp.ge.s32.totalorder %s529_s16, 1 }
   0x5   : > { %p159_p2 = scmp.lt.s32.totalorder %s529_s16, 5 }
   0x6   : > { %s680_s17 = smov (%p23_p0, %s22_s17), 0  ;;  %s682_s18 = smov (!%p23_p0, %s25_s18), %s525_s15 }
   0x7   : > { %p160_p3 = pnand %p440_p1, %p159_p2  ;;  %p27_p4 = scmp.ge.s32.totalorder %s682_s18, 2 }
   0x8   : > { %s441_s19 = sshll.u32 (!%p160_p3), %s513_s12, 3  ;;  %p192_p5 = scmp.lt.s32.totalorder (!%p160_p3), %s517_s13, 1 }
   0x9   : > { %s684_s18 = smov (%p27_p4, %s682_s18), 0  ;;  %163 = sbr.rel (%p160_p3) target bundleno = 193 (0xc1), region = 32 }
   0xa   : > { %p194_p6 = scmp.lt.s32.totalorder (!%p160_p3), %s441_s19, 15  ;;  %p204_p7 = scmp.lt.s32.totalorder (!%p160_p3), %s513_s12, 1 }
   0xe   : > { %s686_s13 = smov (!%p192_p5, %s517_s13), 1  ;;  %s688_s19 = smov (!%p194_p6, %s441_s19), 15  ;;  %v590_v0 = vld [vmem:[%s672_s1] ss:$0 sm:$0xff] }
   0xf   : > { %s443_s20 = sshll.u32 %s686_s13, 5  ;;  %s442_s21 = sshll.u32 %s688_s19, 1  ;;  %v600_v1 = vld [vmem:[%s673_s2] ss:$0 sm:$0xff] }
  0x10   : > { %s198_s22 = sadd.s32 %s443_s20, %s442_s21  ;;  %s690_s12 = smov (!%p204_p7, %s513_s12), 1 }
  0x11   : > { %s444_s25 = sshll.u32 %s198_s22, 3  ;;  %s445_s4 = sshll.u32 %s686_s13, 1 }
  0x12   : > { %s595_s28 = scalar_lea.vmem %s671_s0, %s444_s25  ;;  %s207_s5 = sadd.s32 %s445_s4, %s690_s12 }
  0x13   : > { %v210_v2 = vld [vmem:[%s595_s28] sm:$0xff]  ;;  %v211_v3 = vld [vmem:[%s595_s28 + $0x8] sm:$0xff]  ;;  %v212_v9 = vld [vmem:[%s595_s28 + $0x10] sm:$0xff]  ;;  %s446_s6 = sshll.u32 %s207_s5, 3 }
  0x14   : > { %v230_v4 = vmul.f32 %v590_v0, %v210_v2  ;;  %v231_v5 = vmul.f32 %v590_v0, %v211_v3  ;;  %v232_v12 = vmul.f32 %v590_v0, %v212_v9  ;;  %v213_v15 = vld [vmem:[%s595_s28 + $0x18] sm:$0xff]  ;;  %v214_v20 = vld [vmem:[%s595_s28 + $0x20] sm:$0xff]  ;;  %v215_v25 = vld [vmem:[%s595_s28 + $0x28] sm:$0xff]  ;;  %s209_s9 = scalar_lea.vmem %s674_s3, %s446_s6 }
  0x15   : > { %v233_v17 = vmul.f32 %v590_v0, %v213_v15  ;;  %v234_v22 = vmul.f32 %v590_v0, %v214_v20  ;;  %v235_v27 = vmul.f32 %v590_v0, %v215_v25  ;;  %v216_v30 = vld [vmem:[%s595_s28 + $0x30] sm:$0xff]  ;;  %v217_v35 = vld [vmem:[%s595_s28 + $0x38] sm:$0xff]  ;;  %v218_v40 = vld [vmem:[%s595_s28 + $0x40] sm:$0xff] }
  0x16   : > { %v250_v6 = vadd.f32 %v600_v1, %v230_v4  ;;  %v251_v8 = vadd.f32 %v600_v1, %v231_v5  ;;  %v252_v14 = vadd.f32 %v600_v1, %v232_v12  ;;  %v236_v32 = vmul.f32 %v590_v0, %v216_v30  ;;  %v219_v45 = vld [vmem:[%s595_s28 + $0x48] sm:$0xff]  ;;  %v220_v50 = vld [vmem:[%s595_s28 + $0x50] sm:$0xff]  ;;  %v221_v55 = vld [vmem:[%s595_s28 + $0x58] sm:$0xff] }
  0x17   : > { %v253_v19 = vadd.f32 %v600_v1, %v233_v17  ;;  %v254_v24 = vadd.f32 %v600_v1, %v234_v22  ;;  %v255_v29 = vadd.f32 %v600_v1, %v235_v27  ;;  %v237_v37 = vmul.f32 %v590_v0, %v217_v35  ;;  %v222_v60 = vld [vmem:[%s595_s28 + $0x60] sm:$0xff]  ;;  %v223_v3 = vld [vmem:[%s595_s28 + $0x68] sm:$0xff] }
  0x18   : > { %vm266_vm0 = vcmp.ge.f32.partialorder %v250_v6, 0.0  ;;  %v282_v7 = vmul.f32 0.2, %v250_v6  ;;  %v283_v11 = vmul.f32 0.2, %v251_v8  ;;  %vm267_vm1 = vcmp.ge.f32.partialorder %v251_v8, 0.0 }
  0x19   : > { %v284_v16 = vmul.f32 0.2, %v252_v14  ;;  %vm268_vm2 = vcmp.ge.f32.partialorder %v252_v14, 0.0  ;;  %v285_v21 = vmul.f32 0.2, %v253_v19  ;;  %vm269_vm3 = vcmp.ge.f32.partialorder %v253_v19, 0.0 }
  0x1a   : > { %v298_v10 = vsel %vm266_vm0, %v250_v6, %v282_v7  ;;  %v299_v13 = vsel %vm267_vm1, %v251_v8, %v283_v11  ;;  %v286_v26 = vmul.f32 0.2, %v254_v24  ;;  %vm270_vm4 = vcmp.ge.f32.partialorder %v254_v24, 0.0  ;;  %v224_v8 = vld [vmem:[%s595_s28 + $0x70] sm:$0xff] }
  0x1b   : > { %314 = vxpose.xlu0.b32.start [1/16] (narrow) %v298_v10, 8  ;;  %v300_v18 = vsel %vm268_vm2, %v252_v14, %v284_v16  ;;  %v301_v23 = vsel %vm269_vm3, %v253_v19, %v285_v21  ;;  %v287_v31 = vmul.f32 0.2, %v255_v29  ;;  %vm271_vm5 = vcmp.ge.f32.partialorder %v255_v29, 0.0 }
  0x1c   : > { %v302_v28 = vsel %vm270_vm4, %v254_v24, %v286_v26  ;;  %v256_v34 = vadd.f32 %v600_v1, %v236_v32  ;;  %v257_v39 = vadd.f32 %v600_v1, %v237_v37  ;;  %v238_v42 = vmul.f32 %v590_v0, %v218_v40 }
  0x1d   : > { %v303_v33 = vsel %vm271_vm5, %v255_v29, %v287_v31  ;;  %v239_v47 = vmul.f32 %v590_v0, %v219_v45  ;;  %v240_v52 = vmul.f32 %v590_v0, %v220_v50  ;;  %v241_v57 = vmul.f32 %v590_v0, %v221_v55 }
  0x1e   : > { %v288_v36 = vmul.f32 0.2, %v256_v34  ;;  %vm272_vm6 = vcmp.ge.f32.partialorder %v256_v34, 0.0  ;;  %v289_v41 = vmul.f32 0.2, %v257_v39  ;;  %vm273_vm7 = vcmp.ge.f32.partialorder %v257_v39, 0.0 }
  0x1f   : > { %v258_v44 = vadd.f32 %v600_v1, %v238_v42  ;;  %v259_v49 = vadd.f32 %v600_v1, %v239_v47  ;;  %v260_v54 = vadd.f32 %v600_v1, %v240_v52  ;;  %v261_v59 = vadd.f32 %v600_v1, %v241_v57 }
  0x20   : > { %v304_v38 = vsel %vm272_vm6, %v256_v34, %v288_v36  ;;  %v305_v43 = vsel %vm273_vm7, %v257_v39, %v289_v41  ;;  %v242_v62 = vmul.f32 %v590_v0, %v222_v60  ;;  %v243_v5 = vmul.f32 %v590_v0, %v223_v3 }
  0x21   : > { %v290_v46 = vmul.f32 0.2, %v258_v44  ;;  %vm274_vm8 = vcmp.ge.f32.partialorder %v258_v44, 0.0  ;;  %v291_v51 = vmul.f32 0.2, %v259_v49  ;;  %vm275_vm9 = vcmp.ge.f32.partialorder %v259_v49, 0.0 }
  0x22   : > { %v292_v56 = vmul.f32 0.2, %v260_v54  ;;  %vm276_vm10 = vcmp.ge.f32.partialorder %v260_v54, 0.0  ;;  %v293_v61 = vmul.f32 0.2, %v261_v59  ;;  %vm277_vm11 = vcmp.ge.f32.partialorder %v261_v59, 0.0 }
  0x23   : > { %315 = vxpose.xlu0.b32.cont [2/16] (narrow) %v299_v13, 8  ;;  %v306_v48 = vsel %vm274_vm8, %v258_v44, %v290_v46  ;;  %v307_v53 = vsel %vm275_vm9, %v259_v49, %v291_v51  ;;  %v262_v2 = vadd.f32 %v600_v1, %v242_v62  ;;  %v263_v7 = vadd.f32 %v600_v1, %v243_v5  ;;  %v225_v13 = vld [vmem:[%s595_s28 + $0x78] sm:$0xff] }
  0x24   : > { %v308_v58 = vsel %vm276_vm10, %v260_v54, %v292_v56  ;;  %v309_v63 = vsel %vm277_vm11, %v261_v59, %v293_v61  ;;  %v244_v10 = vmul.f32 %v590_v0, %v224_v8  ;;  %v245_v15 = vmul.f32 %v590_v0, %v225_v13 }
  0x25   : > { %v294_v4 = vmul.f32 0.2, %v262_v2  ;;  %vm278_vm12 = vcmp.ge.f32.partialorder %v262_v2, 0.0  ;;  %v295_v9 = vmul.f32 0.2, %v263_v7  ;;  %vm279_vm13 = vcmp.ge.f32.partialorder %v263_v7, 0.0 }
  0x26   : > { %v264_v12 = vadd.f32 %v600_v1, %v244_v10  ;;  %v265_v17 = vadd.f32 %v600_v1, %v245_v15 }
  0x27   : > { %v310_v6 = vsel %vm278_vm12, %v262_v2, %v294_v4  ;;  %v311_v11 = vsel %vm279_vm13, %v263_v7, %v295_v9 }
  0x28   : > { %v296_v14 = vmul.f32 0.2, %v264_v12  ;;  %vm280_vm14 = vcmp.ge.f32.partialorder %v264_v12, 0.0  ;;  %vm281_vm15 = vcmp.ge.f32.partialorder %v265_v17, 0.0 }
  0x2a   : > { %v312_v16 = vsel %vm280_vm14, %v264_v12, %v296_v14 }
  0x2b   : > { %316 = vxpose.xlu0.b32.cont [3/16] (narrow) %v300_v18, 8  ;;  %v297_v18 = vmul.f32 0.2, %v265_v17 }
  0x2d   : > { %v313_v19 = vsel %vm281_vm15, %v265_v17, %v297_v18 }
  0x33   : > { %317 = vxpose.xlu0.b32.cont [4/16] (narrow) %v301_v23, 8 }
  0x3b   : > { %318 = vxpose.xlu0.b32.cont [5/16] (narrow) %v302_v28, 8 }
  0x43   : > { %319 = vxpose.xlu0.b32.cont [6/16] (narrow) %v303_v33, 8 }
  0x4b   : > { %320 = vxpose.xlu0.b32.cont [7/16] (narrow) %v304_v38, 8 }
  0x53   : > { %321 = vxpose.xlu0.b32.cont [8/16] (narrow) %v305_v43, 8 }
  0x5b   : > { %322 = vxpose.xlu0.b32.cont [9/16] (narrow) %v306_v48, 8 }
  0x63   : > { %323 = vxpose.xlu0.b32.cont [10/16] (narrow) %v307_v53, 8 }
  0x6b   : > { %324 = vxpose.xlu0.b32.cont [11/16] (narrow) %v308_v58, 8 }
  0x73   : > { %325 = vxpose.xlu0.b32.cont [12/16] (narrow) %v309_v63, 8 }
  0x7b   : > { %326 = vxpose.xlu0.b32.cont [13/16] (narrow) %v310_v6, 8 }
  0x83   : > { %327 = vxpose.xlu0.b32.cont [14/16] (narrow) %v311_v11, 8 }
  0x8b   : > { %328 = vxpose.xlu0.b32.cont [15/16] (narrow) %v312_v16, 8 }
  0x93   : > { %329 = vxpose.xlu0.b32.end [16/16] (narrow) %v313_v19, 8 }
  0xbf   : > { %v330_v20 = vpop.trf.xlu0 }
  0xc0   : > { %346 = vst [vmem:[%s209_s9] sm:$0xff] %v330_v20 }
  0xc1 PF: > { %s13_s16 = sadd.s32 1, %s529_s16   ;;  %s675_s12 = smov %s521_s14 }
  0xc2   : > { %p10_p8 = scmp.ge.s32.totalorder %s13_s16, 6   ;;  %s676_s13 = smov %s525_s15 }
  0xc3   : > { %s677_s14 = smov %s680_s17  ;;  %s678_s15 = smov %s684_s18 }
  0xc4   :  { %12 = sbr.rel (!%p10_p8) target bundleno = 3 (0x3), region = 62 }

// kernel: conv_relu.2
= control target key start
LH: loop header
LB: loop body
LE: loop exit
PB: predicated region body
PF: predicated region fallthrough
CT: control target
= control target key end

     0   :  { %s1351_s15 = smov 0   ;;  %s1353_s16 = smov 0   ;;  %s1753_s0 = inlined_call_operand.vmem [shape: bf16[2,20,20,4], index: 0, kind: input, shape index: {}, may-alias: {0,1}]   ;;  %s1754_s1 = inlined_call_operand.vmem [shape: bf16[2,20,20,4], index: 1, kind: input, shape index: {}, may-alias: {0,1}]   ;;  %s1755_s2 = inlined_call_operand.vmem [shape: bf16[36,8], index: 2, kind: input, shape index: {}]   ;;  %s1756_s3 = inlined_call_operand.vmem [shape: f32[2,16,16,8], index: 3, kind: output, shape index: {0}]   ;;  %s1757_s4 = inlined_call_operand.vmem [shape: f32[2,2,8,8], index: 4, kind: output, shape index: {1}]  }
   0x1   :  { %s1355_s17 = smov 0   ;;  %s1357_s18 = smov 0  }
   0x2   :  { %s1359_s19 = smov 0  }
   0x3 LB: > { %s24_s20 = sadd.s32 1, %s1312_s17  ;;  %s27_s21 = sadd.s32 1, %s1316_s18  ;;  %s1320_s19 = sphi %s1359_s19, %s15_s19   ;;  %s1316_s18 = sphi %s1357_s18, %s1761_s18   ;;  %s1312_s17 = sphi %s1355_s17, %s1760_s17   ;;  %s1308_s16 = sphi %s1353_s16, %s1759_s16   ;;  %s1304_s15 = sphi %s1351_s15, %s1758_s15  }
   0x4   : > { %p25_p0 = scmp.ge.s32.totalorder %s24_s20, 2  ;;  %p1125_p1 = scmp.ge.s32.totalorder %s1320_s19, 1 }
   0x5   : > { %p225_p2 = scmp.lt.s32.totalorder %s1320_s19, 5 }
   0x6   : > { %s1763_s20 = smov (%p25_p0, %s24_s20), 0  ;;  %s1765_s21 = smov (!%p25_p0, %s27_s21), %s1316_s18 }
   0x7   : > { %p226_p3 = pnand %p1125_p1, %p225_p2  ;;  %p29_p4 = scmp.ge.s32.totalorder %s1765_s21, 2 }
   0x8   : > { %s1384_s22 = sshll.u32 (!%p226_p3), %s1304_s15, 3  ;;  %p292_p5 = scmp.lt.s32.totalorder (!%p226_p3), %s1308_s16, 1 }
   0x9   : > { %s1767_s21 = smov (%p29_p4, %s1765_s21), 0  ;;  %229 = sbr.rel (%p226_p3) target bundleno = 499 (0x1f3), region = 32 }
   0xa   : > { %p294_p6 = scmp.lt.s32.totalorder (!%p226_p3), %s1384_s22, 19  ;;  %s1225_s26 = sadd.s32 (!%p226_p3), 8, %s1384_s22 }
   0xb   : > { %p312_p7 = scmp.lt.s32.totalorder (!%p226_p3), %s1225_s26, 19  ;;  %s1322_s6 = smov (!%p226_p3), 8  }
   0xc   : > { %s1323_s7 = smov (!%p226_p3), 4   ;;  %s1324_s14 = smov (!%p226_p3), 24  }
   0xd   : > { %p325_p8 = scmp.lt.s32.totalorder (!%p226_p3), %s1384_s22, 15  ;;  %p335_p9 = scmp.lt.s32.totalorder (!%p226_p3), %s1304_s15, 1 }
   0xe   : > { %s1769_s16 = smov (!%p292_p5, %s1308_s16), 1  ;;  %s1771_s26 = smov (!%p312_p7, %s1225_s26), 19  ;;  %vm538_vm0 = vcmask 31744   ;;  %vm587_vm1 = vcmask 64512   ;;  %vm677_vm2 = vcmask 1045504   ;;  %vm636_vm3 = vcmask 1046528  }
   0xf   : > { %s295_s23 = scalar_select %p294_p6, %s1384_s22, 19  ;;  %vm789_vm4 = vcmask 1041408   ;;  %vm718_vm5 = vcmask 97280   ;;  %vm735_vm6 = vcmask 195584   ;;  %vm772_vm7 = vcmask 293888  }
  0x10   : > { %s1236_s24 = smul.u32 60, %s1769_s16  ;;  %s1773_s22 = smov (!%p325_p8, %s1384_s22), 15  ;;  %vm948_vm8 = vcmask 1040384  }
  0x11   : > { %s1235_s25 = smul.u32 3, %s295_s23  ;;  %s1325_s23 = smov 12  }
  0x12   : > { %s1237_s8 = smul.u32 3, %s1771_s26  ;;  %s1132_s30 = sshll.u32 %s1773_s22, 1 }
  0x13   : > { %s298_s27 = sadd.s32 %s1236_s24, %s1235_s25  ;;  %s1775_s15 = smov (!%p335_p9, %s1304_s15), 1 }
  0x14   : > { %s1127_s28 = sshll.u32 %s298_s27, 2  ;;  %s316_s9 = sadd.s32 %s1237_s8, %s1236_s24 }
  0x15   : > { %s1395_s5 = scalar_lea.vmem %s1753_s0, %s1127_s28  ;;  %s1130_s10 = sshll.u32 %s316_s9, 2 }
  0x16   : > { %v1398_v0 = vld [vmem:[%s1395_s5 + $0x30] sm:$0xff]  ;;  %v1401_v1 = vld [vmem:[%s1395_s5 + $0x18] sm:$0xff]  ;;  %v350_v3 = vld [vmem:[%s1395_s5 + $0x20] sm:$0x3]  ;;  %s1430_s13 = scalar_lea.vmem %s1754_s1, %s1130_s10  ;;  %s1135_s22 = sshll.u32 %s1769_s16, 1 }
  0x17   : > { %v356_v2 = vld [vmem:[%s1395_s5 + $0x38] sm:$0x3]  ;;  %506 = vrot.lane.b32.xlu1 %v1398_v0, %s1322_s6  ;;  %458 = vrot.lane.b32.xlu0 %v1401_v1, %s1323_s7  ;;  %v410_v5 = vunpack.c.l.b16 %v350_v3  ;;  %v362_v8 = vld [vmem:[%s1395_s5 + $0x50] sm:$0x3]  ;;  %s338_s11 = sadd.s32 %s1135_s22, %s1775_s15 }
  0x18   : > { %v416_v4 = vunpack.c.l.b16 %v356_v2  ;;  %466 = vrot.lane.b32.xlu2 %v1398_v0, %s1323_s7  ;;  %v422_v9 = vunpack.c.l.b16 %v362_v8  ;;  %v1425_v11 = vld [vmem:[%s1395_s5 + $0x48] sm:$0xff]  ;;  %v1218_v14 = vld [vmem:[%s1430_s13] sm:$0xff]  ;;  %v1220_v27 = vld [vmem:[%s1430_s13 + $0x18] sm:$0xff]  ;;  %s1136_s12 = sshll.u32 %s338_s11, 3 }
  0x19   : > { %v1413_v7 = vpack.c.b16 %v410_v5, %v410_v5  ;;  %v368_v12 = vld [vmem:[%s1430_s13 + $0x8] sm:$0x3]  ;;  %v353_v15 = vld [vmem:[%s1395_s5 + $0x2c] sm:$0x3]  ;;  %v359_v20 = vld [vmem:[%s1395_s5 + $0x44] sm:$0x3] }
  0x1a   : > { %v1411_v6 = vpack.c.b16 %v416_v4, %v416_v4  ;;  %v1422_v10 = vpack.c.b16 %v422_v9, %v422_v9  ;;  %v450_v13 = vunpack.c.l.b16 %v368_v12  ;;  %v413_v17 = vunpack.c.l.b16 %v353_v15  ;;  %v1448_v19 = vld [vmem:[%s1395_s5 + $0x24] sm:$0xff]  ;;  %v1452_v21 = vld [vmem:[%s1395_s5 + $0x3c] sm:$0xff]  ;;  %v1474_v30 = vld [vmem:[%s1395_s5 + $0x54] sm:$0xff] }
  0x1b   : > { %v419_v22 = vunpack.c.l.b16 %v359_v20  ;;  %v374_v24 = vld [vmem:[%s1430_s13 + $0x20] sm:$0x3]  ;;  %v365_v28 = vld [vmem:[%s1395_s5 + $0x5c] sm:$0x3]  ;;  %v371_v32 = vld [vmem:[%s1430_s13 + $0x14] sm:$0x3] }
  0x1c   : > { %v455_v16 = vpack.c.b16 %v450_v13, %v450_v13  ;;  %v1445_v18 = vpack.c.b16 %v413_v17, %v413_v17  ;;  %v498_v25 = vunpack.c.l.b16 %v374_v24  ;;  %v425_v29 = vunpack.c.l.b16 %v365_v28  ;;  %v1219_v33 = vld [vmem:[%s1430_s13 + $0xc] sm:$0xff]  ;;  %v1221_v39 = vld [vmem:[%s1430_s13 + $0x24] sm:$0xff] }
  0x1d   : > { %v1460_v23 = vpack.c.b16 %v419_v22, %v419_v22  ;;  %v453_v34 = vunpack.c.l.b16 %v371_v32  ;;  %v377_v36 = vld [vmem:[%s1430_s13 + $0x2c] sm:$0x3]  ;;  %v344_v42 = vld [vmem:[%s1395_s5 + $0x8] sm:$0x3]  ;;  %v1210_v45 = vld [vmem:[%s1395_s5] sm:$0xff] }
  0x1e   : > { %v503_v26 = vpack.c.b16 %v498_v25, %v498_v25  ;;  %v1476_v31 = vpack.c.b16 %v425_v29, %v425_v29  ;;  %v501_v37 = vunpack.c.l.b16 %v377_v36  ;;  %v404_v46 = vunpack.c.l.b16 %v344_v42  ;;  %v347_v32 = vld [vmem:[%s1395_s5 + $0x14] sm:$0x3] }
  0x1f   : > { %508 = vrot.lane.b32.xlu1 %v1411_v6, %s1322_s6  ;;  %460 = vrot.lane.b32.xlu0 %v1413_v7, %s1323_s7  ;;  %v457_v35 = vpack.c.b16 %v453_v34, %v453_v34 }
  0x20   : > { %468 = vrot.lane.b32.xlu2 %v1411_v6, %s1323_s7  ;;  %v505_v38 = vpack.c.b16 %v501_v37, %v501_v37  ;;  %v427_v48 = vpack.c.b16 %v404_v46, %v404_v46 }
  0x27   : > { %516 = vrot.lane.b32.xlu1 %v1422_v10, %s1322_s6  ;;  %514 = vrot.lane.b32.xlu0 %v1425_v11, %s1322_s6 }
  0x28   : > { %474 = vrot.lane.b32.xlu2 %v1425_v11, %s1323_s7 }
  0x2f   : > { %522 = vrot.lane.b32.xlu1 %v1218_v14, %s1322_s6  ;;  %476 = vrot.lane.b32.xlu0 %v1422_v10, %s1323_s7 }
  0x30   : > { %524 = vrot.lane.b32.xlu2 %v455_v16, %s1322_s6 }
  0x37   : > { %464 = vrot.lane.b32.xlu1 %v1445_v18, %s1323_s7  ;;  %462 = vrot.lane.b32.xlu0 %v1448_v19, %s1323_s7 }
  0x38   : > { %510 = vrot.lane.b32.xlu2 %v1452_v21, %s1322_s6 }
  0x3f   : > { %482 = vrot.lane.b32.xlu1 %v1218_v14, %s1323_s7  ;;  %512 = vrot.lane.b32.xlu0 %v1460_v23, %s1322_s6 }
  0x40   : > { %484 = vrot.lane.b32.xlu2 %v455_v16, %s1323_s7 }
  0x47   : > { %532 = vrot.lane.b32.xlu1 %v503_v26, %s1322_s6  ;;  %530 = vrot.lane.b32.xlu0 %v1220_v27, %s1322_s6 }
  0x48   : > { %470 = vrot.lane.b32.xlu2 %v1452_v21, %s1323_s7 }
  0x4f   : > { %518 = vrot.lane.b32.xlu1 %v1474_v30, %s1322_s6  ;;  %472 = vrot.lane.b32.xlu0 %v1460_v23, %s1323_s7 }
  0x50   : > { %520 = vrot.lane.b32.xlu2 %v1476_v31, %s1322_s6 }
  0x57   : > { %480 = vrot.lane.b32.xlu1 %v1476_v31, %s1323_s7  ;;  %478 = vrot.lane.b32.xlu0 %v1474_v30, %s1323_s7 }
  0x58   : > { %526 = vrot.lane.b32.xlu2 %v1219_v33, %s1322_s6 }
  0x5f   : > { %486 = vrot.lane.b32.xlu1 %v1219_v33, %s1323_s7  ;;  %528 = vrot.lane.b32.xlu0 %v457_v35, %s1322_s6 }
  0x60   : > { %488 = vrot.lane.b32.xlu2 %v457_v35, %s1323_s7  ;;  %v1211_v35 = vld [vmem:[%s1395_s5 + $0xc] sm:$0xff]  ;;  %s1133_s5 = sshll.u32 %s1769_s16, 5 }
  0x67   : > { %536 = vrot.lane.b32.xlu1 %v505_v38, %s1322_s6  ;;  %534 = vrot.lane.b32.xlu0 %v1221_v39, %s1322_s6  ;;  %s329_s6 = sadd.s32 %s1133_s5, %s1132_s30 }
  0x68   : > { %s1134_s7 = sshll.u32 %s329_s6, 3 }
  0x69   : > { %s1658_s10 = scalar_lea.vmem %s1756_s3, %s1134_s7 }
  0x72   : > { %v467_v40 = vpop.permute.xlu2 %466 }
  0x73   : > { %v553_v63 = vsel %vm538_vm0, %v1401_v1, %v467_v40 }
  0x7a   : > { %v469_v41 = vpop.permute.xlu2 %468 }
  0x7b   : > { %v556_v61 = vsel %vm538_vm0, %v1413_v7, %v469_v41 }
  0x82   : > { %v475_v49 = vpop.permute.xlu2 %474 }
  0x83   : > { %v565_v1 = vsel %vm538_vm0, %v1398_v0, %v475_v49 }
  0x89   : > { %v507_v43 = vpop.permute.xlu1 %506  ;;  %v459_v44 = vpop.permute.xlu0 %458 }
  0x8a   : > { %v541_v47 = vsel %vm538_vm0, %v1210_v45, %v459_v44  ;;  %v525_v62 = vpop.permute.xlu2 %524 }
  0x8b   : > { %v1502_v50 = vsel %vm587_vm1, %v541_v47, %v507_v43 }
  0x8c   : > { %v678_v57 = vrot.slane %v1502_v50, 2  ;;  %v637_v58 = vrot.slane %v1502_v50, 1 }
  0x91   : > { %v509_v51 = vpop.permute.xlu1 %508  ;;  %v461_v52 = vpop.permute.xlu0 %460 }
  0x92   : > { %v544_v53 = vsel %vm538_vm0, %v427_v48, %v461_v52  ;;  %v511_v22 = vpop.permute.xlu2 %510 }
  0x93   : > { %v591_v54 = vsel %vm587_vm1, %v544_v53, %v509_v51 }
  0x94   : > { %v638_v55 = vrot.slane %v591_v54, 1  ;;  %v679_v56 = vrot.slane %v591_v54, 2 }
  0x96   : > { %v680_v59 = vsel %vm677_vm2, %v678_v57, %v679_v56  ;;  %v639_v60 = vsel %vm636_vm3, %v637_v58, %v638_v55 }
  0x97   : > { %702 = vrot.lane.b32.xlu0 %v680_v59, %s1324_s14  ;;  %661 = vrot.lane.b32.xlu2 %v639_v60, %s1325_s23 }
  0x99   : > { %v517_v2 = vpop.permute.xlu1 %516  ;;  %v515_v3 = vpop.permute.xlu0 %514 }
  0x9a   : > { %v599_v4 = vsel %vm587_vm1, %v556_v61, %v517_v2  ;;  %v1518_v5 = vsel %vm587_vm1, %v553_v63, %v515_v3  ;;  %v485_v36 = vpop.permute.xlu2 %484 }
  0x9b   : > { %v644_v8 = vrot.slane %v599_v4, 1  ;;  %v685_v9 = vrot.slane %v599_v4, 2  ;;  %v643_v7 = vrot.slane %v1518_v5, 1  ;;  %v684_v12 = vrot.slane %v1518_v5, 2 }
  0x9c   : > { %v580_v52 = vsel %vm538_vm0, %v1422_v10, %v485_v36 }
  0x9d   : > { %v645_v13 = vsel %vm636_vm3, %v643_v7, %v644_v8  ;;  %v686_v14 = vsel %vm677_vm2, %v684_v12, %v685_v9 }
  0x9e   : > { %665 = vrot.lane.b32.xlu1 %v645_v13, %s1325_s23 }
  0x9f   : > { %706 = vrot.lane.b32.xlu2 %v686_v14, %s1324_s14 }
  0xa1   : > { %v523_v15 = vpop.permute.xlu1 %522  ;;  %v477_v16 = vpop.permute.xlu0 %476 }
  0xa2   : > { %v1529_v17 = vsel %vm587_vm1, %v565_v1, %v523_v15  ;;  %v568_v20 = vsel %vm538_vm0, %v1411_v6, %v477_v16  ;;  %v407_v6 = vunpack.c.l.b16 %v347_v32  ;;  %v471_v51 = vpop.permute.xlu2 %470 }
  0xa3   : > { %v649_v24 = vrot.slane %v1529_v17, 1  ;;  %v690_v25 = vrot.slane %v1529_v17, 2  ;;  %v607_v26 = vsel %vm587_vm1, %v568_v20, %v525_v62 }
  0xa4   : > { %v650_v27 = vrot.slane %v607_v26, 1  ;;  %v691_v0 = vrot.slane %v607_v26, 2  ;;  %v429_v37 = vpack.c.b16 %v407_v6, %v407_v6 }
  0xa6   : > { %v692_v28 = vsel %vm677_vm2, %v690_v25, %v691_v0  ;;  %v651_v29 = vsel %vm636_vm3, %v649_v24, %v650_v27 }
  0xa7   : > { %710 = vrot.lane.b32.xlu1 %v692_v28, %s1324_s14  ;;  %669 = vrot.lane.b32.xlu0 %v651_v29, %s1325_s23 }
  0xa9   : > { %v465_v33 = vpop.permute.xlu1 %464  ;;  %v463_v34 = vpop.permute.xlu0 %462 }
  0xaa   : > { %v547_v38 = vsel %vm538_vm0, %v1211_v35, %v463_v34  ;;  %v550_v40 = vsel %vm538_vm0, %v429_v37, %v465_v33  ;;  %v521_v63 = vpop.permute.xlu2 %520  ;;  %v756_v37 = vld [vmem:[%s1755_s2 + $0x10] sm:$0x3] }
  0xab   : > { %v1544_v39 = vsel %vm587_vm1, %v547_v38, %v511_v22 }
  0xac   : > { %v640_v44 = vrot.slane %v1544_v39, 1  ;;  %v681_v45 = vrot.slane %v1544_v39, 2 }
  0xb1   : > { %v483_v41 = vpop.permute.xlu1 %482  ;;  %v513_v42 = vpop.permute.xlu0 %512 }
  0xb2   : > { %v595_v43 = vsel %vm587_vm1, %v550_v40, %v513_v42  ;;  %v577_v53 = vsel %vm538_vm0, %v1425_v11, %v483_v41  ;;  %v559_v11 = vsel %vm538_vm0, %v1448_v19, %v471_v51  ;;  %v527_v20 = vpop.permute.xlu2 %526  ;;  %v766_v41 = vunpack.c.l.b16 %v756_v37 }
  0xb3   : > { %v641_v46 = vrot.slane %v595_v43, 1  ;;  %v682_v47 = vrot.slane %v595_v43, 2 }
  0xb5   : > { %v683_v48 = vsel %vm677_vm2, %v681_v45, %v682_v47  ;;  %v642_v49 = vsel %vm636_vm3, %v640_v44, %v641_v46 }
  0xb6   : > { %704 = vrot.lane.b32.xlu0 %v683_v48, %s1324_s14  ;;  %663 = vrot.lane.b32.xlu2 %v642_v49, %s1325_s23  ;;  %v1223_v48 = vld [vmem:[%s1755_s2 + $0x8] sm:$0xff]  ;;  %v1222_v49 = vld [vmem:[%s1755_s2] sm:$0xff] }
  0xb9   : > { %v533_v54 = vpop.permute.xlu1 %532  ;;  %v531_v55 = vpop.permute.xlu0 %530 }
  0xba   : > { %v615_v56 = vsel %vm587_vm1, %v580_v52, %v533_v54  ;;  %v1560_v57 = vsel %vm587_vm1, %v577_v53, %v531_v55  ;;  %v489_v33 = vpop.permute.xlu2 %488 }
  0xbb   : > { %v656_v58 = vrot.slane %v615_v56, 1  ;;  %v697_v59 = vrot.slane %v615_v56, 2  ;;  %v655_v60 = vrot.slane %v1560_v57, 1  ;;  %v696_v61 = vrot.slane %v1560_v57, 2 }
  0xbd   : > { %v657_v62 = vsel %vm636_vm3, %v655_v60, %v656_v58  ;;  %v698_v10 = vsel %vm677_vm2, %v696_v61, %v697_v59 }
  0xbe   : > { %673 = vrot.lane.b32.xlu1 %v657_v62, %s1325_s23  ;;  %714 = vrot.lane.b32.xlu2 %v698_v10, %s1324_s14 }
  0xc1   : > { %v519_v2 = vpop.permute.xlu1 %518  ;;  %v473_v3 = vpop.permute.xlu0 %472 }
  0xc2   : > { %v1571_v4 = vsel %vm587_vm1, %v559_v11, %v519_v2  ;;  %v562_v8 = vsel %vm538_vm0, %v1445_v18, %v473_v3 }
  0xc3   : > { %v646_v9 = vrot.slane %v1571_v4, 1  ;;  %v687_v7 = vrot.slane %v1571_v4, 2  ;;  %v603_v12 = vsel %vm587_vm1, %v562_v8, %v521_v63 }
  0xc4   : > { %v647_v13 = vrot.slane %v603_v12, 1  ;;  %v688_v14 = vrot.slane %v603_v12, 2 }
  0xc6   : > { %v689_v1 = vsel %vm677_vm2, %v687_v7, %v688_v14  ;;  %v648_v19 = vsel %vm636_vm3, %v646_v9, %v647_v13 }
  0xc7   : > { %708 = vrot.lane.b32.xlu1 %v689_v1, %s1324_s14  ;;  %667 = vrot.lane.b32.xlu0 %v648_v19, %s1325_s23 }
  0xc9   : > { %v481_v15 = vpop.permute.xlu1 %480  ;;  %v479_v16 = vpop.permute.xlu0 %478 }
  0xca   : > { %v571_v18 = vsel %vm538_vm0, %v1452_v21, %v479_v16  ;;  %v574_v24 = vsel %vm538_vm0, %v1460_v23, %v481_v15  ;;  %v586_v23 = vsel %vm538_vm0, %v1476_v31, %v489_v33 }
  0xcb   : > { %v1585_v22 = vsel %vm587_vm1, %v571_v18, %v527_v20 }
  0xcc   : > { %v652_v0 = vrot.slane %v1585_v22, 1  ;;  %v693_v28 = vrot.slane %v1585_v22, 2 }
  0xd1   : > { %v487_v25 = vpop.permute.xlu1 %486  ;;  %v529_v26 = vpop.permute.xlu0 %528 }
  0xd2   : > { %v611_v27 = vsel %vm587_vm1, %v574_v24, %v529_v26  ;;  %v583_v34 = vsel %vm538_vm0, %v1474_v30, %v487_v25  ;;  %v769_v30 = vpack.c.b16 %v766_v41, %v766_v41 }
  0xd3   : > { %v653_v29 = vrot.slane %v611_v27, 1  ;;  %v694_v32 = vrot.slane %v611_v27, 2 }
  0xd4   : > { %v791_v47 = vsel %vm789_vm4, %v769_v30, 0 }
  0xd5   : > { %v695_v6 = vsel %vm677_vm2, %v693_v28, %v694_v32  ;;  %v654_v21 = vsel %vm636_vm3, %v652_v0, %v653_v29  ;;  %798 = vmatpush.bf16.msra.mxu0 %v791_v47  ;;  %1226 = vmatpush.bf16.msra.mxu1 %v791_v47 }
  0xd6   : > { %712 = vrot.lane.b32.xlu0 %v695_v6, %s1324_s14  ;;  %671 = vrot.lane.b32.xlu2 %v654_v21, %s1325_s23 }
  0xd7   : > { %1227 = vmatpush.bf16.msra.mxu2 %v791_v47  ;;  %1228 = vmatpush.bf16.msra.mxu3 %v791_v47 }
  0xd9   : > { %v537_v35 = vpop.permute.xlu1 %536  ;;  %v535_v36 = vpop.permute.xlu0 %534  ;;  %799 = vmatpush.bf16.msra.mxu0 %v1223_v48  ;;  %1229 = vmatpush.bf16.msra.mxu1 %v1223_v48 }
  0xda   : > { %v619_v38 = vsel %vm587_vm1, %v586_v23, %v537_v35  ;;  %v1605_v40 = vsel %vm587_vm1, %v583_v34, %v535_v36 }
  0xdb   : > { %v659_v42 = vrot.slane %v619_v38, 1  ;;  %v700_v43 = vrot.slane %v619_v38, 2  ;;  %v658_v31 = vrot.slane %v1605_v40, 1  ;;  %v699_v44 = vrot.slane %v1605_v40, 2  ;;  %1230 = vmatpush.bf16.msra.mxu2 %v1223_v48  ;;  %1231 = vmatpush.bf16.msra.mxu3 %v1223_v48 }
  0xdd   : > { %v660_v45 = vsel %vm636_vm3, %v658_v31, %v659_v42  ;;  %v701_v46 = vsel %vm677_vm2, %v699_v44, %v700_v43  ;;  %800 = vmatpush.bf16.msra.mxu0 %v1222_v49  ;;  %1232 = vmatpush.bf16.msra.mxu1 %v1222_v49 }
  0xde   : > { %675 = vrot.lane.b32.xlu1 %v660_v45, %s1325_s23  ;;  %716 = vrot.lane.b32.xlu2 %v701_v46, %s1324_s14  ;;  %s340_s23 = scalar_lea.vmem %s1757_s4, %s1136_s12 }
  0xdf   : > { %1233 = vmatpush.bf16.msra.mxu2 %v1222_v49  ;;  %1234 = vmatpush.bf16.msra.mxu3 %v1222_v49 }
  0xf1   : > { %v662_v51 = vpop.permute.xlu2 %661 }
  0xf2   : > { %v720_v52 = vsel %vm718_vm5, %v1502_v50, %v662_v51 }
  0xf9   : > { %v707_v56 = vpop.permute.xlu2 %706 }
 0x109   : > { %v703_v53 = vpop.permute.xlu0 %702 }
 0x10a   : > { %v737_v54 = vsel %vm735_vm6, %v720_v52, %v703_v53 }
 0x10b   : > { %1193 = vmatmul.msk.bf16.vlgmr.msra.gmra.mxu0 %vm772_vm7, %v737_v54 }
 0x110   : > { %v666_v55 = vpop.permute.xlu1 %665  ;;  %v664_v10 = vpop.permute.xlu2 %663 }
 0x111   : > { %v724_v58 = vsel %vm718_vm5, %v1518_v5, %v666_v55  ;;  %v722_v11 = vsel %vm718_vm5, %v1544_v39, %v664_v10 }
 0x112   : > { %v741_v59 = vsel %vm735_vm6, %v724_v58, %v707_v56 }
 0x113   : > { %1195 = vmatmul.msk.bf16.vlgmr.msra.gmra.mxu1 %vm772_vm7, %v741_v59 }
 0x118   : > { %v715_v3 = vpop.permute.xlu2 %714 }
 0x119   : > { %v711_v60 = vpop.permute.xlu1 %710  ;;  %v670_v61 = vpop.permute.xlu0 %669 }
 0x11a   : > { %v728_v62 = vsel %vm718_vm5, %v1529_v17, %v670_v61 }
 0x11b   : > { %v745_v50 = vsel %vm735_vm6, %v728_v62, %v711_v60 }
 0x11c   : > { %1197 = vmatmul.msk.bf16.vlgmr.msra.gmra.mxu2 %vm772_vm7, %v745_v50 }
 0x128   : > { %v705_v63 = vpop.permute.xlu0 %704 }
 0x129   : > { %v739_v5 = vsel %vm735_vm6, %v722_v11, %v705_v63 }
 0x12a   : > { %1194 = vmatmul.msk.bf16.gmra.mxu0 %vm772_vm7, %v739_v5 }
 0x130   : > { %v674_v2 = vpop.permute.xlu1 %673  ;;  %v672_v13 = vpop.permute.xlu2 %671 }
 0x131   : > { %v732_v8 = vsel %vm718_vm5, %v1560_v57, %v674_v2  ;;  %v730_v57 = vsel %vm718_vm5, %v1585_v22, %v672_v13 }
 0x132   : > { %v749_v17 = vsel %vm735_vm6, %v732_v8, %v715_v3 }
 0x133   : > { %1199 = vmatmul.msk.bf16.vlgmr.msra.gmra.mxu3 %vm772_vm7, %v749_v17 }
 0x138   : > { %v717_v15 = vpop.permute.xlu2 %716 }
 0x139   : > { %v709_v9 = vpop.permute.xlu1 %708  ;;  %v668_v7 = vpop.permute.xlu0 %667 }
 0x13a   : > { %v726_v39 = vsel %vm718_vm5, %v1571_v4, %v668_v7 }
 0x13b   : > { %v743_v12 = vsel %vm735_vm6, %v726_v39, %v709_v9 }
 0x13c   : > { %1196 = vmatmul.msk.bf16.gmra.mxu1 %vm772_vm7, %v743_v12 }
 0x148   : > { %v713_v14 = vpop.permute.xlu0 %712 }
 0x149   : > { %v747_v1 = vsel %vm735_vm6, %v730_v57, %v713_v14 }
 0x14a   : > { %1198 = vmatmul.msk.bf16.gmra.mxu2 %vm772_vm7, %v747_v1 }
 0x150   : > { %v676_v19 = vpop.permute.xlu1 %675 }
 0x151   : > { %v734_v16 = vsel %vm718_vm5, %v1605_v40, %v676_v19 }
 0x152   : > { %v751_v4 = vsel %vm735_vm6, %v734_v16, %v717_v15 }
 0x153   : > { %1200 = vmatmul.msk.bf16.gmra.mxu3 %vm772_vm7, %v751_v4 }
 0x188   : > { %v802_v20 = vpop.f32.mrf.mxu0 }
 0x189   : > { %842 = vst.msk [vmem:[%s1658_s10] sm:$0xff] %vm587_vm1, %v802_v20  ;;  %v895_v32 = vmul.f32 %v802_v20, %v802_v20  ;;  %v858_v23 = vsel %vm587_vm1, %v802_v20, 0.0 }
 0x18b   : > { %v911_v38 = vsel %vm587_vm1, %v895_v32, 0.0 }
 0x190   : > { %v804_v18 = vpop.f32.mrf.mxu0  ;;  %v812_v22 = vpop.f32.mrf.mxu1 }
 0x191   : > { %843 = vst.msk [vmem:[%s1658_s10 + $0x8] sm:$0xff] %vm587_vm1, %v804_v18  ;;  %v896_v28 = vmul.f32 %v804_v18, %v804_v18  ;;  %v859_v33 = vsel %vm587_vm1, %v804_v18, 0.0  ;;  %v899_v46 = vmul.f32 %v812_v22, %v812_v22  ;;  %v865_v49 = vsel %vm587_vm1, %v812_v22, 0.0 }
 0x192   : > { %846 = vst.msk [vmem:[%s1658_s10 + $0x20] sm:$0xff] %vm587_vm1, %v812_v22  ;;  %v860_v37 = vadd.f32 %v859_v33, %v858_v23 }
 0x193   : > { %v912_v34 = vsel %vm587_vm1, %v896_v28, 0.0  ;;  %v918_v52 = vsel %vm587_vm1, %v899_v46, 0.0 }
 0x194   : > { %v913_v42 = vadd.f32 %v912_v34, %v911_v38 }
 0x198   : > { %v814_v24 = vpop.f32.mrf.mxu1 }
 0x199   : > { %847 = vst.msk [vmem:[%s1658_s10 + $0x28] sm:$0xff] %vm587_vm1, %v814_v24  ;;  %v900_v53 = vmul.f32 %v814_v24, %v814_v24  ;;  %v867_v56 = vsel %vm587_vm1, %v814_v24, 0.0 }
 0x19b   : > { %v920_v61 = vsel %vm587_vm1, %v900_v53, 0.0 }
 0x19f   : > { %v822_v25 = vpop.f32.mrf.mxu2 }
 0x1a0   : > { %850 = vst.msk [vmem:[%s1658_s10 + $0x40] sm:$0xff] %vm587_vm1, %v822_v25  ;;  %v903_v3 = vmul.f32 %v822_v25, %v822_v25  ;;  %v873_v9 = vsel %vm587_vm1, %v822_v25, 0.0 }
 0x1a2   : > { %v926_v39 = vsel %vm587_vm1, %v903_v3, 0.0 }
 0x1a7   : > { %v807_v26 = vpop.f32.mrf.mxu0  ;;  %v824_v27 = vpop.f32.mrf.mxu2 }
 0x1a8   : > { %844 = vst.msk [vmem:[%s1658_s10 + $0x10] sm:$0xff] %vm587_vm1, %v807_v26  ;;  %v897_v6 = vmul.f32 %v807_v26, %v807_v26  ;;  %v861_v35 = vsel %vm587_vm1, %v807_v26, 0.0  ;;  %v904_v12 = vmul.f32 %v824_v27, %v824_v27  ;;  %v875_v14 = vsel %vm587_vm1, %v824_v27, 0.0 }
 0x1a9   : > { %851 = vst.msk [vmem:[%s1658_s10 + $0x48] sm:$0xff] %vm587_vm1, %v824_v27  ;;  %v862_v43 = vadd.f32 %v861_v35, %v860_v37 }
 0x1aa   : > { %v914_v40 = vsel %vm587_vm1, %v897_v6, 0.0  ;;  %v928_v15 = vsel %vm587_vm1, %v904_v12, 0.0 }
 0x1ab   : > { %v915_v30 = vadd.f32 %v914_v40, %v913_v42 }
 0x1af   : > { %v809_v0 = vpop.f32.mrf.mxu0 }
 0x1b0   : > { %845 = vst.msk [vmem:[%s1658_s10 + $0x18] sm:$0xff] %vm587_vm1, %v809_v0  ;;  %v898_v36 = vmul.f32 %v809_v0, %v809_v0  ;;  %v863_v41 = vsel %vm587_vm1, %v809_v0, 0.0 }
 0x1b1   : > { %v864_v45 = vadd.f32 %v863_v41, %v862_v43 }
 0x1b2   : > { %v916_v31 = vsel %vm587_vm1, %v898_v36, 0.0 }
 0x1b3   : > { %v917_v47 = vadd.f32 %v916_v31, %v915_v30  ;;  %v866_v51 = vadd.f32 %v865_v49, %v864_v45 }
 0x1b5   : > { %v919_v55 = vadd.f32 %v918_v52, %v917_v47  ;;  %v868_v60 = vadd.f32 %v867_v56, %v866_v51 }
 0x1b6   : > { %v1676_v29 = vpop.f32.mrf.mxu3 }
 0x1b7   : > { %854 = vst.msk [vmem:[%s1658_s10 + $0x60] sm:$0xff] %vm587_vm1, %v1676_v29  ;;  %v921_v11 = vadd.f32 %v920_v61, %v919_v55  ;;  %v907_v22 = vmul.f32 %v1676_v29, %v1676_v29  ;;  %v881_v28 = vsel %vm587_vm1, %v1676_v29, 0.0 }
 0x1b9   : > { %v817_v21 = vpop.f32.mrf.mxu1  ;;  %v934_v23 = vsel %vm587_vm1, %v907_v22, 0.0 }
 0x1ba   : > { %848 = vst.msk [vmem:[%s1658_s10 + $0x30] sm:$0xff] %vm587_vm1, %v817_v21  ;;  %v901_v54 = vmul.f32 %v817_v21, %v817_v21  ;;  %v869_v58 = vsel %vm587_vm1, %v817_v21, 0.0 }
 0x1bb   : > { %v870_v10 = vadd.f32 %v869_v58, %v868_v60 }
 0x1bc   : > { %v922_v62 = vsel %vm587_vm1, %v901_v54, 0.0 }
 0x1bd   : > { %v923_v5 = vadd.f32 %v922_v62, %v921_v11 }
 0x1be   : > { %v834_v44 = vpop.f32.mrf.mxu3 }
 0x1bf   : > { %855 = vst.msk [vmem:[%s1658_s10 + $0x68] sm:$0xff] %vm587_vm1, %v834_v44  ;;  %v908_v32 = vmul.f32 %v834_v44, %v834_v44  ;;  %v883_v34 = vsel %vm587_vm1, %v834_v44, 0.0 }
 0x1c1   : > { %v819_v48 = vpop.f32.mrf.mxu1  ;;  %v936_v38 = vsel %vm587_vm1, %v908_v32, 0.0 }
 0x1c2   : > { %849 = vst.msk [vmem:[%s1658_s10 + $0x38] sm:$0xff] %vm587_vm1, %v819_v48  ;;  %v902_v59 = vmul.f32 %v819_v48, %v819_v48  ;;  %v871_v50 = vsel %vm587_vm1, %v819_v48, 0.0 }
 0x1c3   : > { %v872_v2 = vadd.f32 %v871_v50, %v870_v10 }
 0x1c4   : > { %v924_v63 = vsel %vm587_vm1, %v902_v59, 0.0 }
 0x1c5   : > { %v925_v8 = vadd.f32 %v924_v63, %v923_v5  ;;  %v874_v7 = vadd.f32 %v873_v9, %v872_v2 }
 0x1c7   : > { %v927_v57 = vadd.f32 %v926_v39, %v925_v8  ;;  %v876_v19 = vadd.f32 %v875_v14, %v874_v7 }
 0x1c9   : > { %v929_v20 = vadd.f32 %v928_v15, %v927_v57 }
 0x1cd   : > { %v827_v17 = vpop.f32.mrf.mxu2 }
 0x1ce   : > { %852 = vst.msk [vmem:[%s1658_s10 + $0x50] sm:$0xff] %vm587_vm1, %v827_v17  ;;  %v905_v13 = vmul.f32 %v827_v17, %v827_v17  ;;  %v877_v1 = vsel %vm587_vm1, %v827_v17, 0.0 }
 0x1cf   : > { %v878_v4 = vadd.f32 %v877_v1, %v876_v19 }
 0x1d0   : > { %v930_v16 = vsel %vm587_vm1, %v905_v13, 0.0 }
 0x1d1   : > { %v931_v27 = vadd.f32 %v930_v16, %v929_v20 }
 0x1d5   : > { %v829_v18 = vpop.f32.mrf.mxu2 }
 0x1d6   : > { %853 = vst.msk [vmem:[%s1658_s10 + $0x58] sm:$0xff] %vm587_vm1, %v829_v18  ;;  %v879_v24 = vsel %vm587_vm1, %v829_v18, 0.0  ;;  %v906_v25 = vmul.f32 %v829_v18, %v829_v18  ;;  %v837_v26 = vpop.f32.mrf.mxu3 }
 0x1d7   : > { %v880_v0 = vadd.f32 %v879_v24, %v878_v4  ;;  %856 = vst.msk [vmem:[%s1658_s10 + $0x70] sm:$0xff] %vm587_vm1, %v837_v26  ;;  %v909_v35 = vmul.f32 %v837_v26, %v837_v26  ;;  %v885_v40 = vsel %vm587_vm1, %v837_v26, 0.0 }
 0x1d8   : > { %v932_v33 = vsel %vm587_vm1, %v906_v25, 0.0 }
 0x1d9   : > { %v882_v6 = vadd.f32 %v881_v28, %v880_v0  ;;  %v933_v21 = vadd.f32 %v932_v33, %v931_v27  ;;  %v938_v42 = vsel %vm587_vm1, %v909_v35, 0.0 }
 0x1db   : > { %v935_v36 = vadd.f32 %v934_v23, %v933_v21  ;;  %v884_v37 = vadd.f32 %v883_v34, %v882_v6 }
 0x1dd   : > { %v886_v29 = vadd.f32 %v885_v40, %v884_v37  ;;  %v937_v41 = vadd.f32 %v936_v38, %v935_v36 }
 0x1de   : > { %v839_v43 = vpop.f32.mrf.mxu3 }
 0x1df   : > { %v939_v31 = vadd.f32 %v938_v42, %v937_v41  ;;  %857 = vst.msk [vmem:[%s1658_s10 + $0x78] sm:$0xff] %vm587_vm1, %v839_v43  ;;  %v887_v30 = vsel %vm587_vm1, %v839_v43, 0.0  ;;  %v910_v44 = vmul.f32 %v839_v43, %v839_v43 }
 0x1e0   : > { %v888_v45 = vadd.f32 %v887_v30, %v886_v29 }
 0x1e1   : > { %v940_v46 = vsel %vm587_vm1, %v910_v44, 0.0 }
 0x1e2   : > { %v889_v47 = vrot.slane %v888_v45, 4  ;;  %v941_v48 = vadd.f32 %v940_v46, %v939_v31 }
 0x1e4   : > { %v890_v49 = vadd.f32 %v889_v47, %v888_v45  ;;  %v942_v51 = vrot.slane %v941_v48, 4 }
 0x1e6   : > { %v891_v52 = vrot.slane %v890_v49, 2  ;;  %v943_v53 = vadd.f32 %v942_v51, %v941_v48 }
 0x1e8   : > { %v892_v54 = vadd.f32 %v891_v52, %v890_v49  ;;  %v944_v55 = vrot.slane %v943_v53, 2 }
 0x1ea   : > { %v893_v56 = vrot.slane %v892_v54, 1  ;;  %v945_v58 = vadd.f32 %v944_v55, %v943_v53 }
 0x1ec   : > { %v946_v59 = vrot.slane %v945_v58, 1  ;;  %v894_v60 = vadd.f32 %v893_v56, %v892_v54 }
 0x1ee   : > { %v947_v61 = vadd.f32 %v946_v59, %v945_v58 }
 0x1f0   : > { %v949_v62 = vsel %vm948_vm8, %v894_v60, %v947_v61 }
 0x1f1   : > { %v950_v50 = vsel %vm789_vm4, %v949_v62, 0.0 }
 0x1f2   : > { %951 = vst.msk [vmem:[%s340_s23] sm:$0xff] %vm587_vm1, %v950_v50 }
 0x1f3 PF: > { %s15_s19 = sadd.s32 1, %s1320_s19   ;;  %s1758_s15 = smov %s1312_s17 }
 0x1f4   : > { %p12_p10 = scmp.ge.s32.totalorder %s15_s19, 6   ;;  %s1759_s16 = smov %s1316_s18 }
 0x1f5   : > { %s1760_s17 = smov %s1763_s20  ;;  %s1761_s18 = smov %s1767_s21 }
 0x1f6   :  { %14 = sbr.rel (!%p12_p10) target bundleno = 3 (0x3), region = 77 }

</bundles_post_ra>
